<compile_context>
chip_gen: v6e
topology: v6e:2x2x1
jax: 0.10.0
libtpu: 0.0.40
codegen_flags: <defaults>
</compile_context>

<pallas_src>
import functools
import math

import jax
import jax.numpy as jnp
import numpy as np
from jax import lax
from jax.experimental import pallas as pl
from jax.experimental.pallas import tpu as pltpu


def _round_up(n, m):
    return ((n + m - 1) // m) * m


# ----------------------------------------------------------------------------- kernels
def _component_logits(x_ref, ic_ref, mic_ref, bias_ref):
    """Shared core: y[k, n] = -sum_d (x[n,d]-m[k,d])^2 * ic[k,d] + bias[k].

    Expanded as  y = -(ic @ x2^T) + 2*(mic @ x^T) + bias, done as two MXU
    matmuls contracting the feature axis D with f32 accumulation.
    """
    x = x_ref[...]                                   # (TN, D) f32
    x2 = x * x                                       # VPU
    t1 = lax.dot_general(ic_ref[...], x2, (((1,), (1,)), ((), ())),
                         preferred_element_type=jnp.float32)       # (K, TN)
    t2 = lax.dot_general(mic_ref[...], x, (((1,), (1,)), ((), ())),
                         preferred_element_type=jnp.float32)       # (K, TN)
    return -t1 + 2.0 * t2 + bias_ref[...]            # bias is (K, 1), broadcasts


def _gms_unsupervised_kernel(x_ref, ic_ref, mic_ref, bias_ref, out_ref):
    """Unsupervised branch (GaussianMixture.forward): logsumexp over components."""
    y = _component_logits(x_ref, ic_ref, mic_ref, bias_ref)        # (K, TN)
    m = jnp.max(y, axis=0, keepdims=True)                          # (1, TN)
    lse = m + jnp.log(jnp.sum(jnp.exp(y - m), axis=0, keepdims=True))
    out_ref[...] = lse                                             # lane-dense store


def _gms_supervised_kernel(x_ref, lbl_ref, cls_ref, ic_ref, mic_ref, bias_ref,
                           out_ref, *, nclass):
    """Supervised branch: sum y over the Ncpc components of the labeled class,
    scaled by Nclass.  Selection mask is built in-kernel from int32 labels."""
    y = _component_logits(x_ref, ic_ref, mic_ref, bias_ref)        # (K, TN)
    sel = cls_ref[...] == lbl_ref[...]               # (K,1) == (1,TN) -> (K,TN)
    y_sel = jnp.sum(jnp.where(sel, y, 0.0), axis=0, keepdims=True)  # (1, TN)
    out_ref[...] = y_sel * nclass                                   # lane-dense store


# ----------------------------------------------------------------------------- module
class GaussianMixtureSupervisedPallas:
    """JAX/Pallas port of GaussianMixtureSupervised (covariance_type='diagonal')."""

    def __init__(self, Nclass, Ncompperclass, dim,
                 mean_init=(2.0, 5.0), sd_init=(0.5, 1.0), weight_alpha=1,
                 block_rows=512, key=jax.random.PRNGKey(0)):
        self.Nclass = Nclass
        self.Ncpc = Ncompperclass
        self.dim = dim
        self.n_mix_comp = Nclass * Ncompperclass
        self.block_rows = int(block_rows)            # rows per grid step (sweepable)
        self._mean_radius = float(mean_init[0])
        self._mean_sharpness = float(mean_init[1])
        self._sd_init = sd_init
        self._weight_alpha = weight_alpha

        # deterministic parameter init (replicates softball sampling for means)
        k1, k2 = jax.random.split(key)
        g = jax.random.normal(k1, (self.n_mix_comp, dim), dtype=jnp.float32)
        g = g / jnp.linalg.norm(g, axis=-1, keepdims=True)
        rad = self._mean_radius * jax.random.uniform(
            k2, (self.n_mix_comp, 1), dtype=jnp.float32) ** (1.0 / dim)
        self.mean = (g * rad).astype(jnp.float32)                        # (K, D)
        self.log_var = jnp.full((self.n_mix_comp, dim),
                                2.0 * math.log(sd_init[0]), jnp.float32)  # (K, D) diagonal
        self.weight = jnp.ones((self.n_mix_comp,), jnp.float32)          # (K,)

        self._log_var_factor = 0.5          # diagonal covariance
        self._pi_term = -0.5 * dim * math.log(2.0 * math.pi)
        self._dirichlet_constant = (math.lgamma(self.n_mix_comp * weight_alpha)
                                    - self.n_mix_comp * math.lgamma(weight_alpha))
        self._softball_norm = (math.lgamma(1.0 + dim * 0.5)
                               - dim * (math.log(self._mean_radius) + 0.5 * math.log(math.pi)))
        self._lv_prior_mean = -2.0 * math.log(sd_init[0])
        self._lv_prior_sd = float(sd_init[1])

    # --- parameter-only glue (scalar prior) -----------------------------------
    def _prior_log_prob(self):
        p = self._dirichlet_constant
        if self._weight_alpha != 1:
            probs = jax.nn.softmax(self.weight, axis=-1)
            p = p + (self._weight_alpha - 1.0) * jnp.sum(jnp.log(probs))
        # softball prior on means
        mnorm = jnp.linalg.norm(self.mean, axis=-1)
        p = p + jnp.sum(self._softball_norm
                        - jnp.log(1.0 + jnp.exp(self._mean_sharpness
                                                * (mnorm / self._mean_radius - 1.0))))
        # gaussian prior on -log_var
        v = -self.log_var
        p = p + jnp.sum(-((v - self._lv_prior_mean) ** 2) / (2.0 * self._lv_prior_sd ** 2)
                        - math.log(self._lv_prior_sd) - 0.5 * math.log(2.0 * math.pi))
        return jnp.asarray(p, jnp.float32)

    # --- forward ---------------------------------------------------------------
    def forward(self, x, label=None):
        x = jnp.asarray(x, jnp.float32)
        N, D = x.shape
        K = self.n_mix_comp

        # Row tile: multiple of 128 (lane-dense output), as large as configured.
        TN = min(self.block_rows, _round_up(max(N, 1), 128))
        Np = _round_up(N, TN)
        if Np != N:
            x = jnp.pad(x, ((0, Np - N), (0, 0)))
        grid = (Np // TN,)

        # Precompute MXU-friendly parameters once in plain JAX.
        cov = jnp.exp(self.log_var)                           # (K, D)
        ic = (0.5 / cov).astype(jnp.float32)                  # 1/(2*cov)      (K, D)
        mic = (self.mean * ic).astype(jnp.float32)            # mean/(2*cov)   (K, D)
        c_k = jnp.sum(self.mean * self.mean * ic, axis=-1)    # (K,)
        lv_sum = jnp.sum(self.log_var, axis=-1)               # (K,)
        prior = self._prior_log_prob()

        x_spec = pl.BlockSpec((TN, D), lambda i: (i, 0))
        param_specs = [
            pl.BlockSpec((K, D), lambda i: (0, 0)),           # ic (resident)
            pl.BlockSpec((K, D), lambda i: (0, 0)),           # mean*ic (resident)
            pl.BlockSpec((K, 1), lambda i: (0, 0)),           # fused per-component bias
        ]
        out_spec = pl.BlockSpec((1, TN), lambda i: (0, i))    # lane-dense output
        out_shape = jax.ShapeDtypeStruct((1, Np), jnp.float32)
        cparams = pltpu.CompilerParams(dimension_semantics=("parallel",))

        if label is None:
            # unsupervised bias = -lvf*sum(log_var) + pi_term + log_softmax(weight) - c_k
            bias = (-self._log_var_factor * lv_sum + self._pi_term
                    + jax.nn.log_softmax(self.weight, axis=0) - c_k)
            bias = bias.reshape(K, 1).astype(jnp.float32)
            out2d = pl.pallas_call(
                _gms_unsupervised_kernel,
                out_shape=out_shape,
                grid=grid,
                in_specs=[x_spec] + param_specs,
                out_specs=out_spec,
                compiler_params=cparams,
            )(x, ic, mic, bias)
            return -(out2d[0, :N] + prior)

        # supervised: the reference *adds* the log_var term here, and the
        # log_softmax is taken within each class over its Ncpc components.
        logsm = jax.nn.log_softmax(
            self.weight.reshape(self.Nclass, self.Ncpc), axis=-1).reshape(K)
        bias = (self._log_var_factor * lv_sum + self._pi_term + logsm - c_k)
        bias = bias.reshape(K, 1).astype(jnp.float32)

        # labels travel as a lane-dense int32 row; class one-hot built in-kernel.
        lbl = jnp.asarray(label, jnp.int32).reshape(1, N)
        if Np != N:
            lbl = jnp.pad(lbl, ((0, 0), (0, Np - N)))
        comp_class = (jnp.arange(K, dtype=jnp.int32) // self.Ncpc).reshape(K, 1)

        out2d = pl.pallas_call(
            functools.partial(_gms_supervised_kernel, nclass=float(self.Nclass)),
            out_shape=out_shape,
            grid=grid,
            in_specs=[x_spec,
                      pl.BlockSpec((1, TN), lambda i: (0, i)),   # labels
                      pl.BlockSpec((K, 1), lambda i: (0, 0)),    # component -> class id
                      ] + param_specs,
            out_specs=out_spec,
            compiler_params=cparams,
        )(x, lbl, comp_class, ic, mic, bias)
        return -(out2d[0, :N] + prior)

    # --- pure-JAX reference (mirrors the PyTorch code line-by-line) ------------
    def reference(self, x, label=None):
        cov = jnp.exp(self.log_var)
        prior = self._prior_log_prob()
        if label is None:
            y = -jnp.sum((x[:, None, :] - self.mean) ** 2 / (2.0 * cov), axis=-1)
            y = y - self._log_var_factor * jnp.sum(self.log_var, axis=-1)
            y = y + self._pi_term
            y = y + jax.nn.log_softmax(self.weight, axis=0)
            y = jax.scipy.special.logsumexp(y, axis=-1)
            return -(y + prior)
        m = self.mean.reshape(self.Nclass, self.Ncpc, -1)
        c = cov.reshape(self.Nclass, self.Ncpc, -1)
        y = -jnp.sum((x[:, None, None, :] - m) ** 2 / (2.0 * c), axis=-1)
        y = y + self._log_var_factor * jnp.sum(
            self.log_var.reshape(self.Nclass, self.Ncpc, -1), axis=-1)
        y = y + self._pi_term
        y = y + jax.nn.log_softmax(self.weight.reshape(self.Nclass, self.Ncpc), axis=-1)
        y = jnp.sum(y, axis=-1)
        y = y[jnp.arange(y.shape[0]), label] * self.Nclass
        return -(y + prior)


# ----------------------------------------------------------------------------- main
if __name__ == "__main__":
    key = jax.random.PRNGKey(0)
    k_model, k_x, k_lbl, k_model2, k_x2, k_lbl2 = jax.random.split(key, 6)

    # --- small case (module-sized example) -------------------------------------
    Nclass, Ncpc, dim, N = 4, 2, 16, 8
    model = GaussianMixtureSupervisedPallas(Nclass, Ncpc, dim, key=k_model)
    x = jax.random.normal(k_x, (N, dim), dtype=jnp.float32)
    label = jax.random.randint(k_lbl, (N,), 0, Nclass)

    out_sup = jax.block_until_ready(model.forward(x, label))
    out_unsup = jax.block_until_ready(model.forward(x))
    ref_sup = jax.block_until_ready(model.reference(x, label))
    ref_unsup = jax.block_until_ready(model.reference(x))
    np.testing.assert_allclose(np.asarray(out_sup), np.asarray(ref_sup), rtol=1e-4, atol=1e-4)
    np.testing.assert_allclose(np.asarray(out_unsup), np.asarray(ref_unsup), rtol=1e-4, atol=1e-4)

    # --- larger case: multi-step grid + row padding (N not a multiple of TN) ---
    Nclass2, Ncpc2, dim2, N2 = 3, 2, 32, 1200
    model2 = GaussianMixtureSupervisedPallas(Nclass2, Ncpc2, dim2,
                                             block_rows=512, key=k_model2)
    x2 = jax.random.normal(k_x2, (N2, dim2), dtype=jnp.float32)
    label2 = jax.random.randint(k_lbl2, (N2,), 0, Nclass2)

    out_sup2 = jax.block_until_ready(model2.forward(x2, label2))
    out_unsup2 = jax.block_until_ready(model2.forward(x2))
    ref_sup2 = jax.block_until_ready(model2.reference(x2, label2))
    ref_unsup2 = jax.block_until_ready(model2.reference(x2))
    np.testing.assert_allclose(np.asarray(out_sup2), np.asarray(ref_sup2), rtol=1e-4, atol=1e-4)
    np.testing.assert_allclose(np.asarray(out_unsup2), np.asarray(ref_unsup2), rtol=1e-4, atol=1e-4)

    # TODO(synk): sampling / torch.distributions-based helpers (sample, component_sample,
    # supervised_sampling, sample_new_points, clustering) are not kernel work and are not ported.
    print("KERNEL_OK")
</pallas_src>

<mosaic_0001>
module attributes {stable_mosaic.version = 11 : i64} {
  func.func @_gms_supervised_kernel(%arg0: i32, %arg1: memref<128x16xf32, #tpu.memory_space<vmem>>, %arg2: memref<1x128xi32, #tpu.memory_space<vmem>>, %arg3: memref<8x1xi32, #tpu.memory_space<vmem>>, %arg4: memref<8x16xf32, #tpu.memory_space<vmem>>, %arg5: memref<8x16xf32, #tpu.memory_space<vmem>>, %arg6: memref<8x1xf32, #tpu.memory_space<vmem>>, %arg7: memref<1x128xf32, #tpu.memory_space<vmem>>) attributes {dimension_semantics = [#tpu.dimension_semantics<parallel>], iteration_bounds = array<i64: 1>, scalar_prefetch = 0 : i64, scratch_operands = 0 : i64, tpu.core_type = #tpu.core_type<tc>, window_params = [{transform_indices = @transform_0, window_bounds = array<i64: 128, 16>}, {transform_indices = @transform_1, window_bounds = array<i64: 1, 128>}, {pipeline_mode = #tpu.pipeline_mode<synchronous>, transform_indices = @transform_2, window_bounds = array<i64: 8, 1>}, {pipeline_mode = #tpu.pipeline_mode<synchronous>, transform_indices = @transform_3, window_bounds = array<i64: 8, 16>}, {pipeline_mode = #tpu.pipeline_mode<synchronous>, transform_indices = @transform_4, window_bounds = array<i64: 8, 16>}, {pipeline_mode = #tpu.pipeline_mode<synchronous>, transform_indices = @transform_5, window_bounds = array<i64: 8, 1>}, {transform_indices = @transform_6, window_bounds = array<i64: 1, 128>}]} {
    %c0 = arith.constant 0 : index
    %c0_0 = arith.constant 0 : index
    %0 = vector.load %arg1[%c0, %c0_0] : memref<128x16xf32, #tpu.memory_space<vmem>>, vector<128x16xf32>
    %1 = arith.mulf %0, %0 : vector<128x16xf32>
    %c0_1 = arith.constant 0 : index
    %c0_2 = arith.constant 0 : index
    %2 = vector.load %arg4[%c0_1, %c0_2] : memref<8x16xf32, #tpu.memory_space<vmem>>, vector<8x16xf32>
    %cst = arith.constant dense<0.000000e+00> : vector<8x128xf32>
    %3 = tpu.matmul %2, %1, %cst {dimension_numbers = #tpu.dot_dimension_numbers<[1], [1], [0], [0], [0, 0, 1, 0], [], []>} : vector<8x16xf32>, vector<128x16xf32>, vector<8x128xf32> -> vector<8x128xf32>
    %c0_3 = arith.constant 0 : index
    %c0_4 = arith.constant 0 : index
    %4 = vector.load %arg5[%c0_3, %c0_4] : memref<8x16xf32, #tpu.memory_space<vmem>>, vector<8x16xf32>
    %cst_5 = arith.constant dense<0.000000e+00> : vector<8x128xf32>
    %5 = tpu.matmul %4, %0, %cst_5 {dimension_numbers = #tpu.dot_dimension_numbers<[1], [1], [0], [0], [0, 0, 1, 0], [], []>} : vector<8x16xf32>, vector<128x16xf32>, vector<8x128xf32> -> vector<8x128xf32>
    %cst_6 = arith.constant 0.000000e+00 : f32
    %6 = vector.broadcast %cst_6 : f32 to vector<8x128xf32>
    %7 = arith.subf %6, %3 : vector<8x128xf32>
    %cst_7 = arith.constant 2.000000e+00 : f32
    %8 = vector.broadcast %cst_7 : f32 to vector<8x128xf32>
    %9 = arith.mulf %8, %5 : vector<8x128xf32>
    %10 = arith.addf %7, %9 : vector<8x128xf32>
    %c0_8 = arith.constant 0 : index
    %c0_9 = arith.constant 0 : index
    %11 = vector.load %arg6[%c0_8, %c0_9] : memref<8x1xf32, #tpu.memory_space<vmem>>, vector<8x1xf32>
    %12 = vector.broadcast %11 : vector<8x1xf32> to vector<8x128xf32>
    %13 = arith.addf %10, %12 : vector<8x128xf32>
    %c0_10 = arith.constant 0 : index
    %c0_11 = arith.constant 0 : index
    %14 = vector.load %arg3[%c0_10, %c0_11] : memref<8x1xi32, #tpu.memory_space<vmem>>, vector<8x1xi32>
    %c0_12 = arith.constant 0 : index
    %c0_13 = arith.constant 0 : index
    %15 = vector.load %arg2[%c0_12, %c0_13] : memref<1x128xi32, #tpu.memory_space<vmem>>, vector<1x128xi32>
    %16 = vector.broadcast %14 : vector<8x1xi32> to vector<8x128xi32>
    %17 = vector.broadcast %15 : vector<1x128xi32> to vector<8x128xi32>
    %18 = arith.cmpi eq, %16, %17 : vector<8x128xi32>
    %cst_14 = arith.constant 0.000000e+00 : f32
    %19 = vector.broadcast %cst_14 : f32 to vector<8x128xf32>
    %20 = arith.select %18, %13, %19 : vector<8x128xi1>, vector<8x128xf32>
    %cst_15 = arith.constant dense<0.000000e+00> : vector<128xf32>
    %21 = vector.multi_reduction <add>, %20, %cst_15 [0] : vector<8x128xf32> to vector<128xf32>
    %22 = vector.shape_cast %21 : vector<128xf32> to vector<1x128xf32>
    %cst_16 = arith.constant 4.000000e+00 : f32
    %23 = vector.broadcast %cst_16 : f32 to vector<1x128xf32>
    %24 = arith.mulf %22, %23 : vector<1x128xf32>
    %c0_17 = arith.constant 0 : index
    %c0_18 = arith.constant 0 : index
    %25 = vector.load %arg7[%c0_17, %c0_18] : memref<1x128xf32, #tpu.memory_space<vmem>>, vector<1x128xf32>
    tpu.vector_store %arg7[%c0_17, %c0_18], %24 {strides = array<i32>} : memref<1x128xf32, #tpu.memory_space<vmem>>, vector<1x128xf32>,
    return
  }
  func.func @transform_0(%arg0: i32) -> (i32, i32) {
    %c0_i32 = arith.constant 0 : i32
    %c0_i32_0 = arith.constant 0 : i32
    return %arg0, %c0_i32 : i32, i32
  }
  func.func @transform_1(%arg0: i32) -> (i32, i32) {
    %c0_i32 = arith.constant 0 : i32
    %c0_i32_0 = arith.constant 0 : i32
    return %c0_i32, %arg0 : i32, i32
  }
  func.func @transform_2(%arg0: i32) -> (i32, i32) {
    %c0_i32 = arith.constant 0 : i32
    %c0_i32_0 = arith.constant 0 : i32
    %c0_i32_1 = arith.constant 0 : i32
    return %c0_i32, %c0_i32_0 : i32, i32
  }
  func.func @transform_3(%arg0: i32) -> (i32, i32) {
    %c0_i32 = arith.constant 0 : i32
    %c0_i32_0 = arith.constant 0 : i32
    %c0_i32_1 = arith.constant 0 : i32
    return %c0_i32, %c0_i32_0 : i32, i32
  }
  func.func @transform_4(%arg0: i32) -> (i32, i32) {
    %c0_i32 = arith.constant 0 : i32
    %c0_i32_0 = arith.constant 0 : i32
    %c0_i32_1 = arith.constant 0 : i32
    return %c0_i32, %c0_i32_0 : i32, i32
  }
  func.func @transform_5(%arg0: i32) -> (i32, i32) {
    %c0_i32 = arith.constant 0 : i32
    %c0_i32_0 = arith.constant 0 : i32
    %c0_i32_1 = arith.constant 0 : i32
    return %c0_i32, %c0_i32_0 : i32, i32
  }
  func.func @transform_6(%arg0: i32) -> (i32, i32) {
    %c0_i32 = arith.constant 0 : i32
    %c0_i32_0 = arith.constant 0 : i32
    return %c0_i32, %arg0 : i32, i32
  }
}

</mosaic_0001>

<bundles_post_ra>
// kernel: tpu_custom_call.1
= control target key start
LH: loop header
LB: loop body
LE: loop exit
PB: predicated region body
PF: predicated region fallthrough
CT: control target
= control target key end

     0   :  { %vm57_vm0 = vcmask 130048   ;;  %v510_v2 = vmov 0.0   ;;  %vm511_vm1 = vmmov 0   ;;  %v512_v6 = vmov 0   ;;  %s683_s0 = inlined_call_operand.vmem [shape: f32[128,16], index: 0, kind: input, shape index: {}]   ;;  %s684_s1 = inlined_call_operand.vmem [shape: s32[1,128], index: 1, kind: input, shape index: {}]   ;;  %s685_s2 = inlined_call_operand.vmem [shape: s32[8,1], index: 2, kind: input, shape index: {}]   ;;  %s686_s3 = inlined_call_operand.vmem [shape: f32[8,16], index: 3, kind: input, shape index: {}]   ;;  %s687_s4 = inlined_call_operand.vmem [shape: f32[8,16], index: 4, kind: input, shape index: {}]   ;;  %s688_s5 = inlined_call_operand.vmem [shape: f32[8,1], index: 5, kind: input, shape index: {}]   ;;  %s689_s6 = inlined_call_operand.hbm [shape: f32[1,128], index: 6, kind: output, shape index: {}]  }
   0x1   :  { %v39_v0 = vld [vmem:[%s683_s0 + $0x78] sm:$0xff]  ;;  %v38_v1 = vld [vmem:[%s683_s0 + $0x70] sm:$0xff]  ;;  %448 = vmatprep.subr.mxu1 %v510_v2  ;;  %413 = vmatprep.subr.mxu0 %v510_v2  ;;  %v37_v5 = vld [vmem:[%s683_s0 + $0x68] sm:$0xff] }
   0x2   :  { %v55_v3 = vmul.f32 %v39_v0, %v39_v0  ;;  %449 = vmatpush3.xpose.msk.msra.mxu1 %vm57_vm0, %v39_v0  ;;  %480 = vmatprep.mubr.msk.f32.mxu1 %vm511_vm1, %v510_v2  ;;  %v54_v4 = vmul.f32 %v38_v1, %v38_v1  ;;  %v304_v7 = vld [vmem:[%s688_s5] sm:$0xff] }
   0x3   :  { %450 = vmatprep.subr.mxu1 %v510_v2  ;;  %445 = vmatprep.mubr.msk.f32.mxu0 %vm511_vm1, %v510_v2 }
   0x4   :  { %414 = vmatpush3.xpose.msk.msra.mxu0 %vm57_vm0, %v55_v3  ;;  %487 = vset.pattern.permute.xlu0 %v512_v6 }
   0x5   :  { %415 = vmatprep.subr.mxu0 %v510_v2 }
   0x6   :  { %451 = vmatpush3.xpose.msk.msra.mxu1 %vm57_vm0, %v38_v1 }
   0x7   :  { %11 = vsyncpa [#allocation3], 0  ;;  %452 = vmatprep.subr.mxu1 %v510_v2  ;;  %v53_v8 = vmul.f32 %v37_v5, %v37_v5  ;;  %v36_v9 = vld [vmem:[%s683_s0 + $0x60] sm:$0xff]  ;;  %307 = vperm.xlu0 %487, %v304_v7   ;;  %v35_v12 = vld [vmem:[%s683_s0 + $0x58] sm:$0xff] }
   0x8   :  { %416 = vmatpush3.xpose.msk.msra.mxu0 %vm57_vm0, %v54_v4  ;;  %v311_v10 = vld [vmem:[%s685_s2] sm:$0xff]  ;;  %v52_v11 = vmul.f32 %v36_v9, %v36_v9  ;;  %v51_v13 = vmul.f32 %v35_v12, %v35_v12  ;;  %v34_v14 = vld [vmem:[%s683_s0 + $0x50] sm:$0xff]  ;;  %v33_v16 = vld [vmem:[%s683_s0 + $0x48] sm:$0xff] }
   0x9   :  { %417 = vmatprep.subr.mxu0 %v510_v2  ;;  %v50_v15 = vmul.f32 %v34_v14, %v34_v14  ;;  %v49_v17 = vmul.f32 %v33_v16, %v33_v16  ;;  %v32_v18 = vld [vmem:[%s683_s0 + $0x40] sm:$0xff]  ;;  %v31_v20 = vld [vmem:[%s683_s0 + $0x38] sm:$0xff]  ;;  %v30_v22 = vld [vmem:[%s683_s0 + $0x30] sm:$0xff] }
   0xa   :  { %453 = vmatpush3.xpose.msk.msra.mxu1 %vm57_vm0, %v37_v5  ;;  %v48_v19 = vmul.f32 %v32_v18, %v32_v18  ;;  %v47_v21 = vmul.f32 %v31_v20, %v31_v20  ;;  %v46_v23 = vmul.f32 %v30_v22, %v30_v22  ;;  %v29_v24 = vld [vmem:[%s683_s0 + $0x28] sm:$0xff]  ;;  %v28_v26 = vld [vmem:[%s683_s0 + $0x20] sm:$0xff]  ;;  %v27_v28 = vld [vmem:[%s683_s0 + $0x18] sm:$0xff] }
   0xb   :  { %454 = vmatprep.subr.mxu1 %v510_v2  ;;  %314 = vperm.xlu0 %487, %v311_v10   ;;  %v45_v25 = vmul.f32 %v29_v24, %v29_v24  ;;  %v44_v27 = vmul.f32 %v28_v26, %v28_v26  ;;  %v43_v29 = vmul.f32 %v27_v28, %v27_v28  ;;  %v26_v30 = vld [vmem:[%s683_s0 + $0x10] sm:$0xff]  ;;  %v25_v32 = vld [vmem:[%s683_s0 + $0x8] sm:$0xff]  ;;  %v24_v34 = vld [vmem:[%s683_s0] sm:$0xff] }
   0xc   :  { %418 = vmatpush3.xpose.msk.msra.mxu0 %vm57_vm0, %v53_v8  ;;  %v42_v31 = vmul.f32 %v26_v30, %v26_v30  ;;  %v41_v33 = vmul.f32 %v25_v32, %v25_v32  ;;  %v40_v35 = vmul.f32 %v24_v34, %v24_v34  ;;  %v179_v36 = vld [vmem:[%s687_s4] sm:$0xff] }
   0xd   :  { %419 = vmatprep.subr.mxu0 %v510_v2  ;;  %v56_v37 = vld [vmem:[%s686_s3] sm:$0xff]  ;;  %s513_s3 = smov [#allocation2]  }
   0xe   :  { %455 = vmatpush3.xpose.msk.msra.mxu1 %vm57_vm0, %v36_v9  ;;  %v378_v46 = vld [vmem:[%s684_s1] ss:$0 sm:$0xff]  ;;  %s336_s2 = sshll.u32 %s513_s3, 4  ;;  %s337_s2 = int_to_ptr.vmem [resolvable:$true] %s336_s2 }
   0xf   :  { %456 = vmatprep.subr.mxu1 %v510_v2  ;;  %s488_s10 = scalar_lea.vmem %s337_s2, 16  ;;  %s492_s11 = scalar_lea.vmem %s337_s2, 32 }
  0x10   :  { %420 = vmatpush3.xpose.msk.msra.mxu0 %vm57_vm0, %v52_v11  ;;  %p489_p0 = scmp.ne.s32.totalorder %s337_s2, %s488_s10  ;;  %p493_p1 = scmp.lt.s32.totalorder %s337_s2, %s337_s2 }
  0x11   :  { %421 = vmatprep.subr.mxu0 %v510_v2  ;;  %p494_p2 = scmp.lt.s32.totalorder %s492_s11, %s488_s10 }
  0x12   :  { %457 = vmatpush3.xpose.msk.msra.mxu1 %vm57_vm0, %v35_v12 }
  0x13   :  { %458 = vmatprep.subr.mxu1 %v510_v2  ;;  %p495_p3 = por %p494_p2, %p493_p1 }
  0x14   :  { %422 = vmatpush3.xpose.msk.msra.mxu0 %vm57_vm0, %v51_v13 }
  0x15   :  { %423 = vmatprep.subr.mxu0 %v510_v2  ;;  %p496_p4 = pnand %p495_p3, %p489_p0 }
  0x16   :  { %459 = vmatpush3.xpose.msk.msra.mxu1 %vm57_vm0, %v34_v14 }
  0x17   :  { %460 = vmatprep.subr.mxu1 %v510_v2 }
  0x18   :  { %424 = vmatpush3.xpose.msk.msra.mxu0 %vm57_vm0, %v50_v15 }
  0x19   :  { %425 = vmatprep.subr.mxu0 %v510_v2 }
  0x1a   :  { %461 = vmatpush3.xpose.msk.msra.mxu1 %vm57_vm0, %v33_v16 }
  0x1b   :  { %462 = vmatprep.subr.mxu1 %v510_v2 }
  0x1c   :  { %426 = vmatpush3.xpose.msk.msra.mxu0 %vm57_vm0, %v49_v17 }
  0x1d   :  { %427 = vmatprep.subr.mxu0 %v510_v2 }
  0x1e   :  { %463 = vmatpush3.xpose.msk.msra.mxu1 %vm57_vm0, %v32_v18 }
  0x1f   :  { %464 = vmatprep.subr.mxu1 %v510_v2 }
  0x20   :  { %428 = vmatpush3.xpose.msk.msra.mxu0 %vm57_vm0, %v48_v19 }
  0x21   :  { %429 = vmatprep.subr.mxu0 %v510_v2 }
  0x22   :  { %465 = vmatpush3.xpose.msk.msra.mxu1 %vm57_vm0, %v31_v20 }
  0x23   :  { %466 = vmatprep.subr.mxu1 %v510_v2 }
  0x24   :  { %430 = vmatpush3.xpose.msk.msra.mxu0 %vm57_vm0, %v47_v21 }
  0x25   :  { %431 = vmatprep.subr.mxu0 %v510_v2 }
  0x26   :  { %467 = vmatpush3.xpose.msk.msra.mxu1 %vm57_vm0, %v30_v22 }
  0x27   :  { %468 = vmatprep.subr.mxu1 %v510_v2 }
  0x28   :  { %432 = vmatpush3.xpose.msk.msra.mxu0 %vm57_vm0, %v46_v23 }
  0x29   :  { %433 = vmatprep.subr.mxu0 %v510_v2 }
  0x2a   :  { %469 = vmatpush3.xpose.msk.msra.mxu1 %vm57_vm0, %v29_v24 }
  0x2b   :  { %470 = vmatprep.subr.mxu1 %v510_v2 }
  0x2c   :  { %434 = vmatpush3.xpose.msk.msra.mxu0 %vm57_vm0, %v45_v25 }
  0x2d   :  { %435 = vmatprep.subr.mxu0 %v510_v2 }
  0x2e   :  { %471 = vmatpush3.xpose.msk.msra.mxu1 %vm57_vm0, %v28_v26 }
  0x2f   :  { %472 = vmatprep.subr.mxu1 %v510_v2 }
  0x30   :  { %436 = vmatpush3.xpose.msk.msra.mxu0 %vm57_vm0, %v44_v27 }
  0x31   :  { %437 = vmatprep.subr.mxu0 %v510_v2 }
  0x32   :  { %473 = vmatpush3.xpose.msk.msra.mxu1 %vm57_vm0, %v27_v28 }
  0x33   :  { %474 = vmatprep.subr.mxu1 %v510_v2 }
  0x34   :  { %438 = vmatpush3.xpose.msk.msra.mxu0 %vm57_vm0, %v43_v29 }
  0x35   :  { %439 = vmatprep.subr.mxu0 %v510_v2 }
  0x36   :  { %475 = vmatpush3.xpose.msk.msra.mxu1 %vm57_vm0, %v26_v30 }
  0x37   :  { %476 = vmatprep.subr.mxu1 %v510_v2 }
  0x38   :  { %440 = vmatpush3.xpose.msk.msra.mxu0 %vm57_vm0, %v42_v31 }
  0x39   :  { %441 = vmatprep.subr.mxu0 %v510_v2 }
  0x3a   :  { %477 = vmatpush3.xpose.msk.msra.mxu1 %vm57_vm0, %v25_v32 }
  0x3b   :  { %478 = vmatprep.subr.mxu1 %v510_v2 }
  0x3c   :  { %442 = vmatpush3.xpose.msk.msra.mxu0 %vm57_vm0, %v41_v33 }
  0x3d   :  { %443 = vmatprep.subr.mxu0 %v510_v2 }
  0x3e   :  { %479 = vmatpush3.xpose.msk.msra.mxu1 %vm57_vm0, %v24_v34 }
  0x40   :  { %444 = vmatpush3.xpose.msk.msra.mxu0 %vm57_vm0, %v40_v35 }
  0x41   :  { %481 = vmatmul.mubr.msk.f32.vlgmr.msra.gmra.mxu1 %vm57_vm0, %v179_v36 }
  0x43   :  { %446 = vmatmul.mubr.msk.f32.vlgmr.msra.gmra.mxu0 %vm57_vm0, %v56_v37 }
  0x82   :  { %v308_v38 = vpop.permute.xlu0 %307 }
  0x86   :  { %v315_v47 = vpop.permute.xlu0 %314 }
  0x87   :  { %vm320_vm2 = vcmp.eq.s32.totalorder %v315_v47, %v378_v46 }
 0x101   :  { %v297_v39 = vpop.f32.mrf.mxu1 }
 0x102   :  { %v302_v40 = vmul.f32 2.0, %v297_v39 }
 0x103   :  { %v175_v41 = vpop.f32.mrf.mxu0  ;;  %v482_v43 = vpop.f32.mrf.mxu1 }
 0x104   :  { %v301_v42 = vsub.f32 0.0, %v175_v41 }
 0x105   :  { %v447_v44 = vpop.f32.mrf.mxu0 }
 0x106   :  { %v303_v45 = vadd.f32 %v302_v40, %v301_v42 }
 0x108   :  { %v310_v48 = vadd.f32 %v308_v38, %v303_v45 }
 0x10a   :  { %v321_v49 = vsel %vm320_vm2, %v310_v48, 0.0 }
 0x10b   :  { %v322_v50 = vrot.slane %v321_v49, 4 }
 0x10d   :  { %v323_v51 = vadd.f32 %v322_v50, %v321_v49 }
 0x10f   :  { %v324_v52 = vrot.slane %v323_v51, 2 }
 0x111   :  { %v325_v53 = vadd.f32 %v324_v52, %v323_v51 }
 0x113   :  { %v326_v54 = vrot.slane %v325_v53, 1 }
 0x115   :  { %v327_v55 = vadd.f32 %v326_v54, %v325_v53 }
 0x117   :  { %v328_v56 = vmul.f32 4.0, %v327_v55 }
 0x119   :  { %329 = vst [vmem:[#allocation2] sm:$0x1] %v328_v56 }
 0x11a   :  { %499 = shalt.err (!%p496_p4)
}
 0x11b   :  { %339 = dma.vmem_to_hbm [thread:$0]  %s337_s2, 16, %s689_s6, [#allocation3]  }
 0x11c   :  { %508 = dma.done.wait [#allocation3], 16  }
 0x11d   :  { %509 = vsyncadd [#allocation3], 4294967280 }
 0x11e   :  { %343 = vsyncpa [#allocation3], 1 }

</bundles_post_ra>
